<compile_context>
chip_gen: v7x
topology: tpu7x:2x2x1
jax: 0.10.0
libtpu: 0.0.40
codegen_flags: <defaults>
</compile_context>

<pallas_src>
import functools

import jax
import jax.numpy as jnp
import numpy as np
from jax.experimental import pallas as pl
from jax.experimental.pallas import tpu as pltpu

ALPHA_M = 1.0        # alpha_m in the source
DS_LIM = 0.01        # ds_lim  (consumed by deform, unused here)
DEFORM_KERNEL = 7    # kernel  (consumed by deform, unused here)

_LANE = 128
_SUBLANE = 8
# Live-block budget (x + w double-buffered + accumulator).  Conservative enough
# for v7x (64 MiB physical / 32 MiB scoped VMEM) while still giving multi-MB
# tiles so the ~0.35 us per-grid-step overhead is amortised on large inputs.
_VMEM_BLOCK_BUDGET = 24 * 1024 * 1024
_VMEM_LIMIT_BYTES = 32 * 1024 * 1024   # explicit scoped-VMEM limit, safe on v5e/v6e/v7x


def _round_up(v, m):
    return -(-v // m) * m


def _pick_s_tile(B, C, S, x_itemsize, max_tile_lanes=None):
    """Spatial tile width (lanes) sized from the VMEM budget; full S if it fits."""
    c_rows = _round_up(C, _SUBLANE)          # x / w channel rows, sublane padded
    b_rows = _round_up(B, _SUBLANE)          # accumulator rows, sublane padded
    bytes_per_lane = (B * c_rows * x_itemsize * 2   # x block, double buffered
                      + c_rows * 4 * 2              # w_comb block (f32), double buffered
                      + b_rows * 4)                 # (B, s_tile) f32 accumulator
    s_tile = max(_LANE, (_VMEM_BLOCK_BUDGET // bytes_per_lane) // _LANE * _LANE)
    if max_tile_lanes is not None:                  # test-only override
        s_tile = min(s_tile, max(_LANE, (max_tile_lanes // _LANE) * _LANE))
    if s_tile >= S:
        return S                                    # single step, block == full array
    return s_tile


def _alpha_kernel(x_ref, w_ref, b_ref, out_ref, acc_ref, *, s_total, s_tile, ragged):
    """alpha = sigmoid( sum_{c,s}(x * w_comb) + b_folded ) * ALPHA_M.

    Grid: 1-D over tiles of the spatial axis S ("arbitrary" / reduction).

    x_ref  : (B, C, s_tile) VMEM  -- encode_ds, channels on sublanes
    w_ref  : (C, s_tile)    VMEM  -- combined weight w1[c]*w2[s], f32
    b_ref  : (1,)           SMEM  -- folded bias  b1*sum(w2) + b2
    out_ref: (B, 1)         VMEM  -- alpha (written once, final step)
    acc_ref: (B, s_tile)    VMEM  -- f32 per-lane partial sums (grid resident)
    """
    k = pl.program_id(0)

    @pl.when(k == 0)
    def _init():
        acc_ref[...] = jnp.zeros_like(acc_ref)

    # VPU multiply (bf16 x promotes to f32 against the f32 weight) followed by
    # the channel contraction.  Lane-dense accumulate; no XLU lane reduce and
    # no narrow (B, 1) store in the steady state.
    prod = x_ref[...] * w_ref[...]              # (B, C, s_tile), f32
    contrib = jnp.sum(prod, axis=1)             # (B, s_tile)

    if ragged:
        # Pallas does NOT zero-fill out-of-range block elements: mask lanes past
        # S so garbage (possibly NaN/Inf) can never reach the accumulator.
        lane = jax.lax.broadcasted_iota(jnp.int32, contrib.shape, 1)
        contrib = jnp.where(k * s_tile + lane < s_total, contrib, 0.0)

    acc_ref[...] += contrib

    @pl.when(k == pl.num_programs(0) - 1)
    def _finalize():
        logit = jnp.sum(acc_ref[...], axis=-1, keepdims=True) + b_ref[0]
        out_ref[...] = (jax.nn.sigmoid(logit) * ALPHA_M).astype(out_ref.dtype)


def decoder_ds_alpha(encode_ds, conv_w, conv_b, lin_w, lin_b, *, max_tile_lanes=None):
    """alpha path of decoder_ds: conv3d(1x1x1) -> flatten -> linear -> sigmoid."""
    B, C = encode_ds.shape[:2]
    S = int(np.prod(encode_ds.shape[2:]))

    # Fold the 1x1x1 conv and the linear layer into one rank-1 weighted
    # reduction over (c, s).  Weight-only work, done once in the wrapper.
    w1 = conv_w.reshape(C, 1).astype(jnp.float32)          # Conv3d(C, 1, 1) weight
    w2 = lin_w.reshape(1, S).astype(jnp.float32)           # Linear(S, 1) weight
    w_comb = w1 * w2                                        # (C, S) f32
    bias = (conv_b.reshape(()) * jnp.sum(w2)
            + lin_b.reshape(())).astype(jnp.float32).reshape(1)   # 1-D SMEM scalar

    x = encode_ds.reshape(B, C, S)   # free contiguous reshape; no padding, no copy

    s_tile = _pick_s_tile(B, C, S, encode_ds.dtype.itemsize, max_tile_lanes)
    n_steps = -(-S // s_tile)
    ragged = (S % s_tile) != 0

    kernel = functools.partial(_alpha_kernel, s_total=S, s_tile=s_tile, ragged=ragged)

    return pl.pallas_call(
        kernel,
        out_shape=jax.ShapeDtypeStruct((B, 1), jnp.float32),
        grid=(n_steps,),
        in_specs=[
            pl.BlockSpec((B, C, s_tile), lambda k: (0, 0, k)),     # x
            pl.BlockSpec((C, s_tile), lambda k: (0, k)),           # w_comb
            pl.BlockSpec(memory_space=pltpu.MemorySpace.SMEM),     # folded bias
        ],
        out_specs=pl.BlockSpec((B, 1), lambda k: (0, 0)),
        scratch_shapes=[pltpu.VMEM((B, s_tile), jnp.float32)],
        compiler_params=pltpu.CompilerParams(
            dimension_semantics=("arbitrary",),                    # reduction axis
            vmem_limit_bytes=_VMEM_LIMIT_BYTES),
    )(x, w_comb, bias)


def decoder_ds_forward(x_dict, orig, mask, params, *, max_tile_lanes=None):
    """Mirrors decoder_ds.forward; deform(...) is unavailable (see TODO above)."""
    alpha = decoder_ds_alpha(
        x_dict["encode_ds"],
        params["conv_w"], params["conv_b"],
        params["lin_w"], params["lin_b"],
        max_tile_lanes=max_tile_lanes,
    )
    # TODO(synk): apply deform(orig.shape, kernel_size=7)(x, orig, alpha, mask, ds_lim)
    return alpha, mask


def _reference_alpha(encode_ds, conv_w, conv_b, lin_w, lin_b):
    """Pure-JAX two-stage reference: conv1x1x1 -> flatten -> linear -> sigmoid."""
    B, C = encode_ds.shape[:2]
    S = int(np.prod(encode_ds.shape[2:]))
    x = encode_ds.astype(jnp.float32).reshape(B, C, S)
    w1 = conv_w.reshape(C).astype(jnp.float32)
    w2 = lin_w.reshape(S).astype(jnp.float32)
    conv = jnp.einsum("bcs,c->bs", x, w1) + conv_b.reshape(()).astype(jnp.float32)
    logit = conv @ w2[:, None] + lin_b.reshape(()).astype(jnp.float32)
    return jax.nn.sigmoid(logit) * ALPHA_M


def _run_case(seed, B, C, D, H, W, dtype=jnp.float32, max_tile_lanes=None, tol=1e-5):
    S = D * H * W
    key = jax.random.PRNGKey(seed)
    k_x, k_orig, k_mask, k_cw, k_cb, k_lw, k_lb = jax.random.split(key, 7)

    encode_ds = jax.random.normal(k_x, (B, C, D, H, W), dtype=jnp.float32).astype(dtype)
    orig = jax.random.normal(k_orig, (B, 1, 16, 16, 16), dtype=jnp.float32)
    mask = (jax.random.uniform(k_mask, (B, 1, 16, 16, 16)) > 0.5).astype(jnp.float32)

    # Shapes from nn.Conv3d(C, 1, kernel_size=1) and nn.Linear(S, 1).
    conv_w = jax.random.normal(k_cw, (1, C, 1, 1, 1), dtype=jnp.float32) / np.sqrt(C)
    conv_b = jax.random.normal(k_cb, (1,), dtype=jnp.float32) * 0.01
    lin_w = jax.random.normal(k_lw, (1, S), dtype=jnp.float32) / np.sqrt(S)
    lin_b = jax.random.normal(k_lb, (1,), dtype=jnp.float32) * 0.01

    params = dict(conv_w=conv_w, conv_b=conv_b, lin_w=lin_w, lin_b=lin_b)
    alpha, _ = decoder_ds_forward({"encode_ds": encode_ds}, orig, mask, params,
                                  max_tile_lanes=max_tile_lanes)
    alpha = jax.block_until_ready(alpha)

    ref = _reference_alpha(encode_ds, conv_w, conv_b, lin_w, lin_b)
    np.testing.assert_allclose(np.asarray(alpha), np.asarray(ref), rtol=tol, atol=tol)
    assert alpha.shape == (B, 1)


if __name__ == "__main__":
    # Module defaults: in_channels=128, bottle = 5*5*5 = 125 -> single-step path,
    # one block covering the full (B, C, S) array (no per-step overhead, no pad).
    _run_case(seed=0, B=2, C=128, D=5, H=5, W=5)
    # bf16 activations (f32 accumulation via promotion against the f32 weight).
    _run_case(seed=0, B=2, C=128, D=5, H=5, W=5, dtype=jnp.bfloat16, tol=1e-4)
    # Forced multi-step path with a ragged last spatial tile (605 = 2*256 + 93)
    # -> exercises the in-kernel iota mask instead of any activation padding.
    _run_case(seed=0, B=2, C=32, D=5, H=11, W=11, max_tile_lanes=256)
    # Forced multi-step path, evenly divisible (no mask emitted).
    _run_case(seed=0, B=2, C=16, D=8, H=8, W=8, max_tile_lanes=128)
    print("KERNEL_OK")
</pallas_src>

<mosaic_0001>
module attributes {stable_mosaic.version = 11 : i64} {
  func.func @_alpha_kernel(%arg0: i32, %arg1: memref<2x128x125xf32, #tpu.memory_space<vmem>>, %arg2: memref<128x125xf32, #tpu.memory_space<vmem>>, %arg3: memref<1xf32, #tpu.memory_space<smem>>, %arg4: memref<2x1xf32, #tpu.memory_space<vmem>>, %arg5: memref<2x125xf32, #tpu.memory_space<vmem>>) attributes {dimension_semantics = [#tpu.dimension_semantics<arbitrary>], iteration_bounds = array<i64: 1>, scalar_prefetch = 0 : i64, scratch_operands = 1 : i64, tpu.core_type = #tpu.core_type<tc>, window_params = [{transform_indices = @transform_0, window_bounds = array<i64: 2, 128, 125>}, {transform_indices = @transform_1, window_bounds = array<i64: 128, 125>}, {transform_indices = @transform_2, window_bounds = array<i64: 1>}, {pipeline_mode = #tpu.pipeline_mode<synchronous>, transform_indices = @transform_3, window_bounds = array<i64: 2, 1>}]} {
    %c0_i32 = arith.constant 0 : i32
    %0 = arith.cmpi eq, %arg0, %c0_i32 : i32
    %1 = arith.extui %0 : i1 to i32
    %c0_i32_0 = arith.constant 0 : i32
    %2 = arith.cmpi ne, %1, %c0_i32_0 : i32
    scf.if %2 {
      %cst_11 = arith.constant 0.000000e+00 : f32
      %15 = vector.broadcast %cst_11 : f32 to vector<2x125xf32>
      %c0_12 = arith.constant 0 : index
      %c0_13 = arith.constant 0 : index
      %16 = vector.load %arg5[%c0_12, %c0_13] : memref<2x125xf32, #tpu.memory_space<vmem>>, vector<2x125xf32>
      tpu.vector_store %arg5[%c0_12, %c0_13], %15 {strides = array<i32>} : memref<2x125xf32, #tpu.memory_space<vmem>>, vector<2x125xf32>,
    } else {
    }
    %c0 = arith.constant 0 : index
    %c0_1 = arith.constant 0 : index
    %c0_2 = arith.constant 0 : index
    %3 = vector.load %arg1[%c0, %c0_1, %c0_2] : memref<2x128x125xf32, #tpu.memory_space<vmem>>, vector<2x128x125xf32>
    %c0_3 = arith.constant 0 : index
    %c0_4 = arith.constant 0 : index
    %4 = vector.load %arg2[%c0_3, %c0_4] : memref<128x125xf32, #tpu.memory_space<vmem>>, vector<128x125xf32>
    %5 = vector.shape_cast %4 : vector<128x125xf32> to vector<1x128x125xf32>
    %6 = vector.broadcast %5 : vector<1x128x125xf32> to vector<2x128x125xf32>
    %7 = arith.mulf %3, %6 : vector<2x128x125xf32>
    %cst = arith.constant dense<0.000000e+00> : vector<2x125xf32>
    %8 = vector.multi_reduction <add>, %7, %cst [1] : vector<2x128x125xf32> to vector<2x125xf32>
    %c0_5 = arith.constant 0 : index
    %c0_6 = arith.constant 0 : index
    %9 = vector.load %arg5[%c0_5, %c0_6] : memref<2x125xf32, #tpu.memory_space<vmem>>, vector<2x125xf32>
    %10 = arith.addf %9, %8 : vector<2x125xf32>
    %c0_7 = arith.constant 0 : index
    %c0_8 = arith.constant 0 : index
    %11 = vector.load %arg5[%c0_7, %c0_8] : memref<2x125xf32, #tpu.memory_space<vmem>>, vector<2x125xf32>
    tpu.vector_store %arg5[%c0_7, %c0_8], %10 {strides = array<i32>} : memref<2x125xf32, #tpu.memory_space<vmem>>, vector<2x125xf32>,
    %c0_i32_9 = arith.constant 0 : i32
    %12 = arith.cmpi eq, %arg0, %c0_i32_9 : i32
    %13 = arith.extui %12 : i1 to i32
    %c0_i32_10 = arith.constant 0 : i32
    %14 = arith.cmpi ne, %13, %c0_i32_10 : i32
    scf.if %14 {
      %c0_11 = arith.constant 0 : index
      %c0_12 = arith.constant 0 : index
      %15 = vector.load %arg5[%c0_11, %c0_12] : memref<2x125xf32, #tpu.memory_space<vmem>>, vector<2x125xf32>
      %cst_13 = arith.constant dense<0.000000e+00> : vector<2xf32>
      %16 = vector.multi_reduction <add>, %15, %cst_13 [1] : vector<2x125xf32> to vector<2xf32>
      %17 = vector.shape_cast %16 : vector<2xf32> to vector<2x1xf32>
      %c0_14 = arith.constant 0 : index
      %18 = memref.load %arg3[%c0_14] : memref<1xf32, #tpu.memory_space<smem>>
      %19 = vector.broadcast %18 : f32 to vector<2x1xf32>
      %20 = arith.addf %17, %19 : vector<2x1xf32>
      %21 = arith.negf %20 : vector<2x1xf32>
      %22 = math.exp %21 : vector<2x1xf32>
      %cst_15 = arith.constant 1.000000e+00 : f32
      %23 = vector.broadcast %cst_15 : f32 to vector<2x1xf32>
      %24 = arith.addf %23, %22 : vector<2x1xf32>
      %25 = arith.divf %23, %24 : vector<2x1xf32>
      %cst_16 = arith.constant 1.000000e+00 : f32
      %26 = vector.broadcast %cst_16 : f32 to vector<2x1xf32>
      %27 = arith.mulf %25, %26 : vector<2x1xf32>
      %c0_17 = arith.constant 0 : index
      %c0_18 = arith.constant 0 : index
      %28 = vector.load %arg4[%c0_17, %c0_18] : memref<2x1xf32, #tpu.memory_space<vmem>>, vector<2x1xf32>
      tpu.vector_store %arg4[%c0_17, %c0_18], %27 {strides = array<i32>} : memref<2x1xf32, #tpu.memory_space<vmem>>, vector<2x1xf32>,
    } else {
    }
    return
  }
  func.func @transform_0(%arg0: i32) -> (i32, i32, i32) {
    %c0_i32 = arith.constant 0 : i32
    %c0_i32_0 = arith.constant 0 : i32
    %c0_i32_1 = arith.constant 0 : i32
    return %c0_i32, %c0_i32_0, %arg0 : i32, i32, i32
  }
  func.func @transform_1(%arg0: i32) -> (i32, i32) {
    %c0_i32 = arith.constant 0 : i32
    %c0_i32_0 = arith.constant 0 : i32
    return %c0_i32, %arg0 : i32, i32
  }
  func.func @transform_2(%arg0: i32) -> i32 {
    %c0_i32 = arith.constant 0 : i32
    %c0_i32_0 = arith.constant 0 : i32
    return %c0_i32 : i32
  }
  func.func @transform_3(%arg0: i32) -> (i32, i32) {
    %c0_i32 = arith.constant 0 : i32
    %c0_i32_0 = arith.constant 0 : i32
    %c0_i32_1 = arith.constant 0 : i32
    return %c0_i32, %c0_i32_0 : i32, i32
  }
}

</mosaic_0001>

<bundles_post_ra>
// kernel: tpu_custom_call.1
= control target key start
LH: loop header
LB: loop body
LE: loop exit
PB: predicated region body
PF: predicated region fallthrough
CT: control target
= control target key end

     0   :  { %vm19_vm0 = vcmask 1016832   ;;  %v213_v0 = vmov 0.0   ;;  %vm101_vm1 = vcmask 1022976   ;;  %vm179_vm2 = vcmask 1041409   ;;  %s419_s0 = inlined_call_operand.vmem [shape: f32[2,128,125], index: 0, kind: input, shape index: {}]   ;;  %s420_s1 = inlined_call_operand.vmem [shape: f32[128,125], index: 1, kind: input, shape index: {}]   ;;  %s421_s2 = inlined_call_operand.<no memory space> [shape: f32[1], index: 2, kind: input, shape index: {}]   ;;  %s422_s3 = inlined_call_operand.vmem [shape: f32[2,1], index: 3, kind: output, shape index: {}]  }
   0x1   :  { %20 = vst.msk [vmem:[#allocation2] sm:$0x3] %vm19_vm0, %v213_v0  ;;  %v21_v1 = vld [vmem:[%s419_s0] sm:$0xff]  ;;  %v22_v2 = vld [vmem:[%s419_s0 + $0x8] sm:$0xff]  ;;  %v23_v5 = vld [vmem:[%s419_s0 + $0x10] sm:$0xff]  ;;  %vm201_vm3 = vcmask 1024  }
   0x2   :  { %v53_v3 = vld [vmem:[%s420_s1] sm:$0xff]  ;;  %v54_v4 = vld [vmem:[%s420_s1 + $0x8] sm:$0xff]  ;;  %v55_v6 = vld [vmem:[%s420_s1 + $0x10] sm:$0xff] }
   0x3   :  { %v24_v7 = vld [vmem:[%s419_s0 + $0x18] sm:$0xff]  ;;  %v69_v9 = vmul.f32 %v53_v3, %v21_v1  ;;  %v70_v10 = vmul.f32 %v54_v4, %v22_v2  ;;  %v25_v11 = vld [vmem:[%s419_s0 + $0x20] sm:$0xff]  ;;  %v71_v14 = vmul.f32 %v55_v6, %v23_v5  ;;  %v38_v15 = vld [vmem:[%s419_s0 + $0x88] sm:$0xff] }
   0x4   :  { %v56_v8 = vld [vmem:[%s420_s1 + $0x18] sm:$0xff]  ;;  %v37_v12 = vld [vmem:[%s419_s0 + $0x80] sm:$0xff]  ;;  %v39_v16 = vld [vmem:[%s419_s0 + $0x90] sm:$0xff]  ;;  %v86_v28 = vmul.f32 %v54_v4, %v38_v15 }
   0x5   :  { %v57_v13 = vld [vmem:[%s420_s1 + $0x20] sm:$0xff]  ;;  %v72_v17 = vmul.f32 %v56_v8, %v24_v7  ;;  %v26_v18 = vld [vmem:[%s419_s0 + $0x28] sm:$0xff]  ;;  %v40_v20 = vld [vmem:[%s419_s0 + $0x98] sm:$0xff]  ;;  %v85_v22 = vmul.f32 %v53_v3, %v37_v12  ;;  %v102_v23 = vsel %vm101_vm1, %v69_v9, 0.0  ;;  %v103_v24 = vsel %vm101_vm1, %v70_v10, 0.0 }
   0x6   :  { %v58_v19 = vld [vmem:[%s420_s1 + $0x28] sm:$0xff]  ;;  %v73_v21 = vmul.f32 %v57_v13, %v25_v11  ;;  %v27_v25 = vld [vmem:[%s419_s0 + $0x30] sm:$0xff]  ;;  %v41_v26 = vld [vmem:[%s419_s0 + $0xa0] sm:$0xff]  ;;  %v87_v29 = vmul.f32 %v55_v6, %v39_v16  ;;  %v104_v30 = vadd.f32 %v103_v24, %v102_v23  ;;  %v105_v31 = vsel %vm101_vm1, %v71_v14, 0.0 }
   0x7   :  { %v59_v27 = vld [vmem:[%s420_s1 + $0x30] sm:$0xff]  ;;  %v74_v32 = vmul.f32 %v58_v19, %v26_v18  ;;  %v107_v33 = vsel %vm101_vm1, %v72_v17, 0.0  ;;  %v28_v34 = vld [vmem:[%s419_s0 + $0x38] sm:$0xff]  ;;  %v88_v36 = vmul.f32 %v56_v8, %v40_v20  ;;  %v42_v38 = vld [vmem:[%s419_s0 + $0xa8] sm:$0xff]  ;;  %v89_v40 = vmul.f32 %v57_v13, %v41_v26 }
   0x8   :  { %v60_v35 = vld [vmem:[%s420_s1 + $0x38] sm:$0xff]  ;;  %v106_v37 = vadd.f32 %v105_v31, %v104_v30  ;;  %v75_v39 = vmul.f32 %v59_v27, %v27_v25  ;;  %v109_v41 = vsel %vm101_vm1, %v73_v21, 0.0  ;;  %v29_v42 = vld [vmem:[%s419_s0 + $0x40] sm:$0xff]  ;;  %v139_v45 = vsel %vm101_vm1, %v85_v22, 0.0  ;;  %v43_v48 = vld [vmem:[%s419_s0 + $0xb0] sm:$0xff] }
   0x9   :  { %v61_v43 = vld [vmem:[%s420_s1 + $0x40] sm:$0xff]  ;;  %v140_v46 = vsel %vm101_vm1, %v86_v28, 0.0  ;;  %v142_v47 = vsel %vm101_vm1, %v87_v29, 0.0  ;;  %v76_v49 = vmul.f32 %v60_v35, %v28_v34  ;;  %v111_v50 = vsel %vm101_vm1, %v74_v32, 0.0  ;;  %v30_v52 = vld [vmem:[%s419_s0 + $0x48] sm:$0xff]  ;;  %v44_v57 = vld [vmem:[%s419_s0 + $0xb8] sm:$0xff] }
   0xa   :  { %v108_v44 = vadd.f32 %v107_v33, %v106_v37  ;;  %v141_v51 = vadd.f32 %v140_v46, %v139_v45  ;;  %v62_v53 = vld [vmem:[%s420_s1 + $0x48] sm:$0xff]  ;;  %v90_v54 = vmul.f32 %v58_v19, %v42_v38  ;;  %v144_v56 = vsel %vm101_vm1, %v88_v36, 0.0  ;;  %v31_v61 = vld [vmem:[%s419_s0 + $0x50] sm:$0xff]  ;;  %v45_v2 = vld [vmem:[%s419_s0 + $0xc0] sm:$0xff] }
   0xb   :  { %v77_v58 = vmul.f32 %v61_v43, %v29_v42  ;;  %v113_v59 = vsel %vm101_vm1, %v75_v39, 0.0  ;;  %v63_v62 = vld [vmem:[%s420_s1 + $0x50] sm:$0xff]  ;;  %v91_v63 = vmul.f32 %v59_v27, %v43_v48  ;;  %v146_v1 = vsel %vm101_vm1, %v89_v40, 0.0  ;;  %v32_v6 = vld [vmem:[%s419_s0 + $0x58] sm:$0xff]  ;;  %v46_v11 = vld [vmem:[%s419_s0 + $0xc8] sm:$0xff] }
   0xc   :  { %v110_v55 = vadd.f32 %v109_v41, %v108_v44  ;;  %v143_v60 = vadd.f32 %v142_v47, %v141_v51  ;;  %v78_v3 = vmul.f32 %v62_v53, %v30_v52  ;;  %v115_v4 = vsel %vm101_vm1, %v76_v49, 0.0  ;;  %v64_v7 = vld [vmem:[%s420_s1 + $0x58] sm:$0xff]  ;;  %v33_v15 = vld [vmem:[%s419_s0 + $0x60] sm:$0xff]  ;;  %v47_v20 = vld [vmem:[%s419_s0 + $0xd0] sm:$0xff] }
   0xd   :  { %v92_v8 = vmul.f32 %v60_v35, %v44_v57  ;;  %v148_v10 = vsel %vm101_vm1, %v90_v54, 0.0  ;;  %v79_v12 = vmul.f32 %v63_v62, %v31_v61  ;;  %v117_v13 = vsel %vm101_vm1, %v77_v58, 0.0  ;;  %v65_v16 = vld [vmem:[%s420_s1 + $0x60] sm:$0xff]  ;;  %v34_v24 = vld [vmem:[%s419_s0 + $0x68] sm:$0xff]  ;;  %v48_v29 = vld [vmem:[%s419_s0 + $0xd8] sm:$0xff] }
   0xe   :  { %v112_v0 = vadd.f32 %v111_v50, %v110_v55  ;;  %v145_v5 = vadd.f32 %v144_v56, %v143_v60  ;;  %v93_v17 = vmul.f32 %v61_v43, %v45_v2  ;;  %v150_v19 = vsel %vm101_vm1, %v91_v63, 0.0  ;;  %v66_v25 = vld [vmem:[%s420_s1 + $0x68] sm:$0xff]  ;;  %v35_v33 = vld [vmem:[%s419_s0 + $0x70] sm:$0xff]  ;;  %v49_v38 = vld [vmem:[%s419_s0 + $0xe0] sm:$0xff] }
   0xf   :  { %v80_v21 = vmul.f32 %v64_v7, %v32_v6  ;;  %v119_v22 = vsel %vm101_vm1, %v78_v3, 0.0  ;;  %v94_v26 = vmul.f32 %v62_v53, %v46_v11  ;;  %v152_v28 = vsel %vm101_vm1, %v92_v8, 0.0  ;;  %v67_v34 = vld [vmem:[%s420_s1 + $0x70] sm:$0xff]  ;;  %v36_v42 = vld [vmem:[%s419_s0 + $0x78] sm:$0xff]  ;;  %v50_v47 = vld [vmem:[%s419_s0 + $0xe8] sm:$0xff] }
  0x10   :  { %v114_v9 = vadd.f32 %v113_v59, %v112_v0  ;;  %v147_v14 = vadd.f32 %v146_v1, %v145_v5  ;;  %v81_v30 = vmul.f32 %v65_v16, %v33_v15  ;;  %v121_v31 = vsel %vm101_vm1, %v79_v12, 0.0  ;;  %v68_v43 = vld [vmem:[%s420_s1 + $0x78] sm:$0xff]  ;;  %v51_v54 = vld [vmem:[%s419_s0 + $0xf0] sm:$0xff] }
  0x11   :  { %v95_v35 = vmul.f32 %v63_v62, %v47_v20  ;;  %v154_v37 = vsel %vm101_vm1, %v93_v17, 0.0  ;;  %v82_v39 = vmul.f32 %v66_v25, %v34_v24  ;;  %v123_v40 = vsel %vm101_vm1, %v80_v21, 0.0  ;;  %v52_v61 = vld [vmem:[%s419_s0 + $0xf8] sm:$0xff] }
  0x12   :  { %v116_v18 = vadd.f32 %v115_v4, %v114_v9  ;;  %v149_v23 = vadd.f32 %v148_v10, %v147_v14  ;;  %v96_v44 = vmul.f32 %v64_v7, %v48_v29  ;;  %v156_v46 = vsel %vm101_vm1, %v94_v26, 0.0 }
  0x13   :  { %v83_v48 = vmul.f32 %v67_v34, %v35_v33  ;;  %v125_v49 = vsel %vm101_vm1, %v81_v30, 0.0  ;;  %v97_v51 = vmul.f32 %v65_v16, %v49_v38  ;;  %v158_v53 = vsel %vm101_vm1, %v95_v35, 0.0 }
  0x14   :  { %v118_v27 = vadd.f32 %v117_v13, %v116_v18  ;;  %v151_v32 = vadd.f32 %v150_v19, %v149_v23  ;;  %v84_v55 = vmul.f32 %v68_v43, %v36_v42  ;;  %v127_v56 = vsel %vm101_vm1, %v82_v39, 0.0 }
  0x15   :  { %v98_v58 = vmul.f32 %v66_v25, %v50_v47  ;;  %v160_v60 = vsel %vm101_vm1, %v96_v44, 0.0  ;;  %v129_v62 = vsel %vm101_vm1, %v83_v48, 0.0  ;;  %v99_v0 = vmul.f32 %v67_v34, %v51_v54 }
  0x16   :  { %v120_v36 = vadd.f32 %v119_v22, %v118_v27  ;;  %v153_v41 = vadd.f32 %v152_v28, %v151_v32  ;;  %v162_v2 = vsel %vm101_vm1, %v97_v51, 0.0  ;;  %v131_v3 = vsel %vm101_vm1, %v84_v55, 0.0  ;;  %v176_v27 = vld [vmem:[#allocation2] sm:$0x3] }
  0x17   :  { %v100_v5 = vmul.f32 %v68_v43, %v52_v61  ;;  %v164_v7 = vsel %vm101_vm1, %v98_v58, 0.0  ;;  %v166_v10 = vsel %vm101_vm1, %v99_v0, 0.0  ;;  %v193_v32 = vstv %s421_s2 }
  0x18   :  { %v122_v45 = vadd.f32 %v121_v31, %v120_v36  ;;  %v155_v50 = vadd.f32 %v154_v37, %v153_v41 }
  0x19   :  { %v168_v13 = vsel %vm101_vm1, %v100_v5, 0.0 }
  0x1a   :  { %v124_v52 = vadd.f32 %v123_v40, %v122_v45  ;;  %v157_v57 = vadd.f32 %v156_v46, %v155_v50 }
  0x1c   :  { %v126_v59 = vadd.f32 %v125_v49, %v124_v52  ;;  %v159_v63 = vadd.f32 %v158_v53, %v157_v57 }
  0x1e   :  { %v128_v1 = vadd.f32 %v127_v56, %v126_v59  ;;  %v161_v4 = vadd.f32 %v160_v60, %v159_v63 }
  0x20   :  { %v130_v6 = vadd.f32 %v129_v62, %v128_v1  ;;  %v163_v8 = vadd.f32 %v162_v2, %v161_v4 }
  0x22   :  { %v132_v9 = vadd.f32 %v131_v3, %v130_v6  ;;  %v165_v11 = vadd.f32 %v164_v7, %v163_v8 }
  0x24   :  { %v133_v12 = vrot.slane %v132_v9, 4  ;;  %v167_v14 = vadd.f32 %v166_v10, %v165_v11 }
  0x26   :  { %v134_v15 = vadd.f32 %v133_v12, %v132_v9  ;;  %v169_v16 = vadd.f32 %v168_v13, %v167_v14 }
  0x28   :  { %v135_v17 = vrot.slane %v134_v15, 2  ;;  %v170_v18 = vrot.slane %v169_v16, 4 }
  0x2a   :  { %v136_v19 = vadd.f32 %v135_v17, %v134_v15  ;;  %v171_v20 = vadd.f32 %v170_v18, %v169_v16 }
  0x2c   :  { %v137_v21 = vrot.slane %v136_v19, 1  ;;  %v172_v22 = vrot.slane %v171_v20, 2 }
  0x2e   :  { %v173_v23 = vadd.f32 %v172_v22, %v171_v20  ;;  %v138_v24 = vadd.f32 %v137_v21, %v136_v19 }
  0x30   :  { %v174_v25 = vrot.slane %v173_v23, 1 }
  0x32   :  { %v175_v26 = vadd.f32 %v174_v25, %v173_v23 }
  0x34   :  { %v180_v28 = vsel %vm179_vm2, %v175_v26, %v138_v24 }
  0x35   :  { %v182_v29 = vadd.f32 %v180_v28, %v176_v27 }
  0x37   :  { %184 = vst.msk [vmem:[#allocation2] sm:$0x3] %vm19_vm0, %v182_v29 }
  0x3e   :  { %v188_v30 = vld [vmem:[#allocation2] sm:$0x3] }
  0x3f   :  { %v189_v31 = vsel %vm19_vm0, %v188_v30, 0.0 }
  0x40   :  { %190 = vadd.xlane.f32.xlu0 %v189_v31 }
  0xcd   :  { %v191_v33 = vpop.xlane.xlu0 %190 }
  0xce   :  { %v194_v34 = vadd.f32 %v193_v32, %v191_v33 }
  0xd0   :  { %v207_v35 = vmul.f32 -1.442695, %v194_v34 }
  0xd2   :  { %209 = vpow2.f32 %v207_v35 }
  0xdc   :  { %v210_v36 = vpop.eup %209 }
  0xdd   :  { %v198_v37 = vadd.f32 1.0, %v210_v36 }
  0xdf   :  { %211 = vrcp.f32 %v198_v37 }
  0xe9   :  { %v212_v38 = vpop.eup %211 }
  0xea   :  { %202 = vst.msk [vmem:[%s422_s3] sm:$0x3] %vm201_vm3, %v212_v38 }

</bundles_post_ra>
